<compile_context>
chip_gen: v5e
topology: v5e:2x2
jax: 0.10.0
libtpu: 0.0.40
codegen_flags: <defaults>
</compile_context>

<pallas_src>
from functools import partial

import jax
import jax.numpy as jnp
from jax.experimental import pallas as pl
from jax.experimental.pallas import tpu as pltpu

_HALO = 128                    # carried-halo width (lanes); requires kernel-1 <= 128
_CHUNK = 512                   # target in-kernel lane-chunk width
_TGT_USEFUL_BYTES = 2 << 20    # ~2 MiB of real HBM data per block (when T allows)
_VMEM_BLOCK_CAP = 4 << 20      # <=4 MiB VMEM footprint per block (v7x-safe w/ 2x2 bufs)


def _convnorm_kernel(x_ref, wm_ref, wv_ref, g_ref, b_ref, o_ref,
                     xh_ref, sh_ref, *, kernel, chunk, n_chunks, use_mxu):
    """One (batch, time-tile) grid step.

    x_ref:  (1, TT, C)  input block, read directly from the (B, T, C) array
    wm_ref: (C, K) [VPU path] or (Kp, C) [MXU path]  softmaxed mean filter
    wv_ref: same layout, softmaxed var filter
    g_ref:  (C, 1) gamma          b_ref: (C, 1) bias
    o_ref:  (1, TT, C) output block
    xh_ref: (C, 128) carried x halo (last 128 time columns seen so far)
    sh_ref: (C, 128) carried sq-dev halo
    """
    K = kernel
    W = chunk
    H = xh_ref.shape[-1]
    first_tile = pl.program_id(1) == 0

    def causal_conv(cur, halo, w):
        # out[t] = sum_{c,k} window[c, t + k] * w[c, k]  with K-1 left context.
        xw = jnp.concatenate([halo, cur], axis=-1)                  # (C, H+W)
        if use_mxu:
            # Channel contraction on the (otherwise idle) MXU, then K
            # lane-shifted (1, W) row adds instead of K (C, W) slices.
            m = jnp.dot(w, xw, preferred_element_type=jnp.float32)  # (Kp, H+W)
            out = m[0:1, H - (K - 1):H - (K - 1) + W]
            for k in range(1, K):
                off = H - (K - 1) + k
                out = out + m[k:k + 1, off:off + W]
            return out                                              # (1, W)
        # VPU path (tiny C): per-channel weighted sum over k, ONE sublane reduce.
        acc = cur * w[:, K - 1:K]
        for k in range(K - 1):
            s = K - 1 - k                                           # left shift
            acc = acc + xw[:, H - s:H - s + W] * w[:, k:k + 1]
        return jnp.sum(acc, axis=0, keepdims=True)                  # (1, W)

    @pl.loop(0, n_chunks)
    def _chunk(ci):
        start = pl.multiple_of(ci * W, W)
        wm = wm_ref[...]
        wv = wv_ref[...]
        g = g_ref[...]                                              # (C, 1)
        b = b_ref[...]                                              # (C, 1)

        xc = x_ref[0, pl.ds(start, W), :].astype(jnp.float32)       # (W, C)
        xc = jnp.transpose(xc)                                      # (C, W)

        @pl.when(jnp.logical_and(first_tile, ci == 0))
        def _():  # replicate-pad of x for the very first chunk of each batch
            xh_ref[...] = jnp.broadcast_to(xc[:, :1], xh_ref.shape)

        mean = causal_conv(xc, xh_ref[...], wm)                     # (1, W)
        d = xc - mean                                               # reused below
        sq = d * d

        @pl.when(jnp.logical_and(first_tile, ci == 0))
        def _():  # replicate-pad of sq_dev (first valid sq_dev column)
            sh_ref[...] = jnp.broadcast_to(sq[:, :1], sh_ref.shape)

        var = causal_conv(sq, sh_ref[...], wv)                      # (1, W)
        inv_std = jax.lax.rsqrt(var + 1e-5)                         # EUP
        y = d * inv_std * g + b                                     # (C, W)
        o_ref[0, pl.ds(start, W), :] = jnp.transpose(y).astype(o_ref.dtype)

        # Carry the last 128 (lane-aligned) columns into the next chunk / tile.
        xh_ref[...] = xc[:, W - H:]
        sh_ref[...] = sq[:, W - H:]


def conv_norm(x_btc, weights_mean, weights_var, gamma, bias=None, kernel=11,
              shared_filter=False, *, time_tile=None, chunk=None,
              io_dtype=None, use_mxu=None):
    """Pallas ConvNorm forward.  x_btc: (batch, time, channels).

    io_dtype: HBM-facing dtype for the activation input/output (e.g.
      jnp.bfloat16 to halve DMA traffic); in-kernel accumulation is always f32.
      Default keeps the input dtype (bit-faithful to the f32 reference).
    """
    if shared_filter:
        # TODO(synk): shared_filter=True (channel-mean pooling before the
        # conv1d) is not implemented in the kernel.
        raise NotImplementedError("shared_filter=True is not implemented")

    B, T, C = x_btc.shape
    K = int(kernel)
    H = _HALO
    assert 1 <= K <= H + 1, "kernel must satisfy 1 <= kernel <= 129"

    io_dtype = x_btc.dtype if io_dtype is None else jnp.dtype(io_dtype)
    isz = jnp.dtype(io_dtype).itemsize
    Cpad = ((C + 127) // 128) * 128

    # ---- time tiling: big, VMEM-bounded, lane-aligned blocks -----------------
    if time_tile is None:
        tt = min(_TGT_USEFUL_BYTES // max(1, C * isz),
                 _VMEM_BLOCK_CAP // max(1, Cpad * isz))
    else:
        tt = int(time_tile)
    TT = max(128, (tt // 128) * 128)
    TT = min(TT, max(128, ((T + 127) // 128) * 128))

    if chunk is None:
        if TT <= _CHUNK:
            CW = TT
        elif TT % 512 == 0:
            CW = 512
        elif TT % 256 == 0:
            CW = 256
        else:
            CW = 128
    else:
        CW = min(max(128, (int(chunk) // 128) * 128), TT)
        if TT % CW:
            CW = 128
    n_chunks = TT // CW
    n_t = pl.cdiv(T, TT)

    if use_mxu is None:
        use_mxu = C >= 64

    # ---- parameters (softmax over the flattened filters, like the module) ----
    wm = jax.nn.softmax(weights_mean.reshape(-1).astype(jnp.float32))
    wm = wm.reshape(weights_mean.shape)[0]                           # (C, K)
    wv = jax.nn.softmax(weights_var.reshape(-1).astype(jnp.float32))
    wv = wv.reshape(weights_var.shape)[0]                            # (C, K)
    if use_mxu:
        Kp = max(8, ((K + 7) // 8) * 8)
        wm = jnp.zeros((Kp, C), jnp.float32).at[:K].set(wm.T)        # (Kp, C)
        wv = jnp.zeros((Kp, C), jnp.float32).at[:K].set(wv.T)
    g = gamma.reshape(C, 1).astype(jnp.float32)
    b = (bias if bias is not None
         else jnp.zeros((C,), jnp.float32)).reshape(C, 1).astype(jnp.float32)

    x = x_btc if x_btc.dtype == io_dtype else x_btc.astype(io_dtype)

    blk_fp = TT * Cpad * isz                      # VMEM footprint of one block
    vmem_limit = int(min(max(4 * blk_fp + (6 << 20), 16 << 20), 32 << 20))

    kern = partial(_convnorm_kernel, kernel=K, chunk=CW, n_chunks=n_chunks,
                   use_mxu=use_mxu)
    w_shape = wm.shape
    out = pl.pallas_call(
        kern,
        out_shape=jax.ShapeDtypeStruct((B, T, C), io_dtype),
        grid=(B, n_t),
        in_specs=[
            pl.BlockSpec((1, TT, C), lambda bi, ti: (bi, ti, 0)),
            pl.BlockSpec(w_shape, lambda bi, ti: (0, 0)),
            pl.BlockSpec(w_shape, lambda bi, ti: (0, 0)),
            pl.BlockSpec((C, 1), lambda bi, ti: (0, 0)),
            pl.BlockSpec((C, 1), lambda bi, ti: (0, 0)),
        ],
        out_specs=pl.BlockSpec((1, TT, C), lambda bi, ti: (bi, ti, 0)),
        scratch_shapes=[pltpu.VMEM((C, H), jnp.float32),
                        pltpu.VMEM((C, H), jnp.float32)],
        compiler_params=pltpu.CompilerParams(
            # TODO(synk): on v7x with batch == 1 the sequential time axis leaves
            # one TensorCore idle; split time into two parallel halves there.
            dimension_semantics=("parallel", "arbitrary"),
            vmem_limit_bytes=vmem_limit),
    )(x, wm, wv, g, b)
    return out


def conv_norm_ref(x_btc, weights_mean, weights_var, gamma, bias, kernel):
    """Pure-JAX reference mirroring the PyTorch forward (non-shared filter)."""
    x = jnp.transpose(x_btc, (0, 2, 1)).astype(jnp.float32)         # (B, C, T)
    B, C, T = x.shape
    wm = jax.nn.softmax(weights_mean.reshape(-1)).reshape(weights_mean.shape)[0]
    wv = jax.nn.softmax(weights_var.reshape(-1)).reshape(weights_var.shape)[0]

    def causal_conv(z, w):
        z_pad = jnp.concatenate(
            [jnp.broadcast_to(z[:, :, :1], (B, C, kernel - 1)), z], axis=2)
        out = jnp.zeros((B, 1, T), jnp.float32)
        for k in range(kernel):
            out = out + jnp.sum(z_pad[:, :, k:k + T] * w[None, :, k:k + 1],
                                axis=1, keepdims=True)
        return out

    mean = causal_conv(x, wm)
    sq_dev = (x - mean) ** 2
    var = causal_conv(sq_dev, wv)
    y = (x - mean) / jnp.sqrt(var + 1e-5)
    y = jnp.transpose(y, (0, 2, 1)) * gamma
    if bias is not None:
        y = y + bias
    return y


if __name__ == "__main__":
    K = 11
    key = jax.random.PRNGKey(0)
    ks = jax.random.split(key, 8)

    def make_params(C, k0, k1, k2, k3):
        wm = 0.1 * jax.random.normal(k0, (1, C, K), jnp.float32)
        wv = 0.1 * jax.random.normal(k1, (1, C, K), jnp.float32)
        g = 1.0 + 0.1 * jax.random.normal(k2, (C,), jnp.float32)
        b = 0.1 * jax.random.normal(k3, (C,), jnp.float32)
        return wm, wv, g, b

    def check(out, ref, atol, rtol, name):
        assert out.shape == ref.shape, (name, out.shape, ref.shape)
        o32 = out.astype(jnp.float32)
        err = float(jnp.max(jnp.abs(o32 - ref)))
        assert jnp.allclose(o32, ref, atol=atol, rtol=rtol), (name, err)

    # Case 1: small single-tile / single-chunk (exercises masked tail, T < 128).
    C = 8
    wm, wv, g, b = make_params(C, ks[0], ks[1], ks[2], ks[3])
    x = jax.random.normal(ks[4], (2, 32, C), jnp.float32)
    out = jax.block_until_ready(conv_norm(x, wm, wv, g, b, kernel=K))
    check(out, conv_norm_ref(x, wm, wv, g, b, K), 2e-4, 2e-4, "case1")

    # Case 2: multiple time tiles -> halo carried across grid steps.
    x2 = jax.random.normal(ks[5], (2, 300, C), jnp.float32)
    out2 = jax.block_until_ready(
        conv_norm(x2, wm, wv, g, b, kernel=K, time_tile=128))
    check(out2, conv_norm_ref(x2, wm, wv, g, b, K), 2e-4, 2e-4, "case2")

    # Case 3: multiple in-kernel chunks per tile + multiple tiles + masked tail.
    x3 = jax.random.normal(ks[6], (1, 260, C), jnp.float32)
    out3 = jax.block_until_ready(
        conv_norm(x3, wm, wv, g, b, kernel=K, time_tile=256, chunk=128))
    check(out3, conv_norm_ref(x3, wm, wv, g, b, K), 2e-4, 2e-4, "case3")

    # Case 4: moderate channel count -> MXU channel-contraction path.
    C4 = 128
    wm4, wv4, g4, b4 = make_params(C4, ks[0], ks[1], ks[2], ks[3])
    x4 = jax.random.normal(ks[7], (1, 256, C4), jnp.float32)
    out4 = jax.block_until_ready(conv_norm(x4, wm4, wv4, g4, b4, kernel=K))
    check(out4, conv_norm_ref(x4, wm4, wv4, g4, b4, K), 1e-3, 1e-3, "case4")

    # Case 5: bfloat16 HBM i/o (halved DMA traffic; f32 accumulation in-kernel).
    x5 = jax.random.normal(ks[5], (2, 200, C), jnp.float32)
    out5 = jax.block_until_ready(
        conv_norm(x5, wm, wv, g, b, kernel=K, io_dtype=jnp.bfloat16))
    check(out5, conv_norm_ref(x5, wm, wv, g, b, K), 1e-1, 1e-1, "case5")

    print("KERNEL_OK")
</pallas_src>

<mosaic_0001>
module attributes {stable_mosaic.version = 11 : i64} {
  func.func @_convnorm_kernel(%arg0: i32, %arg1: i32, %arg2: memref<1x128x8xf32, #tpu.memory_space<vmem>>, %arg3: memref<8x11xf32, #tpu.memory_space<vmem>>, %arg4: memref<8x11xf32, #tpu.memory_space<vmem>>, %arg5: memref<8x1xf32, #tpu.memory_space<vmem>>, %arg6: memref<8x1xf32, #tpu.memory_space<vmem>>, %arg7: memref<1x128x8xf32, #tpu.memory_space<vmem>>, %arg8: memref<8x128xf32, #tpu.memory_space<vmem>>, %arg9: memref<8x128xf32, #tpu.memory_space<vmem>>) attributes {dimension_semantics = [#tpu.dimension_semantics<parallel>, #tpu.dimension_semantics<arbitrary>], iteration_bounds = array<i64: 2, 1>, scalar_prefetch = 0 : i64, scratch_operands = 2 : i64, tpu.core_type = #tpu.core_type<tc>, window_params = [{transform_indices = @transform_0, window_bounds = array<i64: 1, 128, 8>}, {pipeline_mode = #tpu.pipeline_mode<synchronous>, transform_indices = @transform_1, window_bounds = array<i64: 8, 11>}, {pipeline_mode = #tpu.pipeline_mode<synchronous>, transform_indices = @transform_2, window_bounds = array<i64: 8, 11>}, {pipeline_mode = #tpu.pipeline_mode<synchronous>, transform_indices = @transform_3, window_bounds = array<i64: 8, 1>}, {pipeline_mode = #tpu.pipeline_mode<synchronous>, transform_indices = @transform_4, window_bounds = array<i64: 8, 1>}, {transform_indices = @transform_5, window_bounds = array<i64: 1, 128, 8>}]} {
    %c0_i32 = arith.constant 0 : i32
    %0 = arith.cmpi eq, %arg1, %c0_i32 : i32
    %c0_i32_0 = arith.constant 0 : i32
    %c1_i32 = arith.constant 1 : i32
    %1 = arith.muli %c0_i32_0, %c1_i32 : i32
    %c0_i32_1 = arith.constant 0 : i32
    %2 = arith.addi %c0_i32_1, %1 : i32
    %c128_i32 = arith.constant 128 : i32
    %3 = arith.muli %2, %c128_i32 : i32
    %4 = tpu.assume_multiple %3, 128 : i32
    %c0 = arith.constant 0 : index
    %c0_2 = arith.constant 0 : index
    %5 = vector.load %arg3[%c0, %c0_2] : memref<8x11xf32, #tpu.memory_space<vmem>>, vector<8x11xf32>
    %c0_3 = arith.constant 0 : index
    %c0_4 = arith.constant 0 : index
    %6 = vector.load %arg4[%c0_3, %c0_4] : memref<8x11xf32, #tpu.memory_space<vmem>>, vector<8x11xf32>
    %c0_5 = arith.constant 0 : index
    %c0_6 = arith.constant 0 : index
    %7 = vector.load %arg5[%c0_5, %c0_6] : memref<8x1xf32, #tpu.memory_space<vmem>>, vector<8x1xf32>
    %c0_7 = arith.constant 0 : index
    %c0_8 = arith.constant 0 : index
    %8 = vector.load %arg6[%c0_7, %c0_8] : memref<8x1xf32, #tpu.memory_space<vmem>>, vector<8x1xf32>
    %c0_9 = arith.constant 0 : index
    %9 = arith.index_cast %4 : i32 to index
    %c0_10 = arith.constant 0 : index
    %10 = vector.load %arg2[%c0_9, %9, %c0_10] : memref<1x128x8xf32, #tpu.memory_space<vmem>>, vector<1x128x8xf32>
    %11 = vector.shape_cast %10 : vector<1x128x8xf32> to vector<128x8xf32>
    %12 = tpu.transpose %11, [1, 0] : vector<128x8xf32> -> vector<8x128xf32>
    %c0_i32_11 = arith.constant 0 : i32
    %13 = arith.cmpi eq, %2, %c0_i32_11 : i32
    %14 = arith.andi %0, %13 : i1
    %15 = arith.extui %14 : i1 to i32
    %c0_i32_12 = arith.constant 0 : i32
    %16 = arith.cmpi ne, %15, %c0_i32_12 : i32
    scf.if %16 {
      %154 = vector.extract_strided_slice %12 {offsets = [0, 0], sizes = [8, 1], strides = [1, 1]} : vector<8x128xf32> to vector<8x1xf32>
      %155 = vector.shape_cast %154 : vector<8x1xf32> to vector<8x1xf32>
      %156 = vector.broadcast %155 : vector<8x1xf32> to vector<8x128xf32>
      %c0_28 = arith.constant 0 : index
      %c0_29 = arith.constant 0 : index
      %157 = vector.load %arg8[%c0_28, %c0_29] : memref<8x128xf32, #tpu.memory_space<vmem>>, vector<8x128xf32>
      tpu.vector_store %arg8[%c0_28, %c0_29], %156 {strides = array<i32>} : memref<8x128xf32, #tpu.memory_space<vmem>>, vector<8x128xf32>,
    } else {
    }
    %c0_13 = arith.constant 0 : index
    %c0_14 = arith.constant 0 : index
    %17 = vector.load %arg8[%c0_13, %c0_14] : memref<8x128xf32, #tpu.memory_space<vmem>>, vector<8x128xf32>
    %18 = tpu.concatenate %17, %12 in 1 : vector<8x128xf32>, vector<8x128xf32> -> vector<8x256xf32>
    %19 = vector.extract_strided_slice %5 {offsets = [0, 10], sizes = [8, 1], strides = [1, 1]} : vector<8x11xf32> to vector<8x1xf32>
    %20 = vector.broadcast %19 : vector<8x1xf32> to vector<8x128xf32>
    %21 = arith.mulf %12, %20 : vector<8x128xf32>
    %22 = vector.extract_strided_slice %18 {offsets = [0, 118], sizes = [8, 128], strides = [1, 1]} : vector<8x256xf32> to vector<8x128xf32>
    %23 = vector.extract_strided_slice %5 {offsets = [0, 0], sizes = [8, 1], strides = [1, 1]} : vector<8x11xf32> to vector<8x1xf32>
    %24 = vector.broadcast %23 : vector<8x1xf32> to vector<8x128xf32>
    %25 = arith.mulf %22, %24 : vector<8x128xf32>
    %26 = arith.addf %21, %25 : vector<8x128xf32>
    %27 = vector.extract_strided_slice %18 {offsets = [0, 119], sizes = [8, 128], strides = [1, 1]} : vector<8x256xf32> to vector<8x128xf32>
    %28 = vector.extract_strided_slice %5 {offsets = [0, 1], sizes = [8, 1], strides = [1, 1]} : vector<8x11xf32> to vector<8x1xf32>
    %29 = vector.broadcast %28 : vector<8x1xf32> to vector<8x128xf32>
    %30 = arith.mulf %27, %29 : vector<8x128xf32>
    %31 = arith.addf %26, %30 : vector<8x128xf32>
    %32 = vector.extract_strided_slice %18 {offsets = [0, 120], sizes = [8, 128], strides = [1, 1]} : vector<8x256xf32> to vector<8x128xf32>
    %33 = vector.extract_strided_slice %5 {offsets = [0, 2], sizes = [8, 1], strides = [1, 1]} : vector<8x11xf32> to vector<8x1xf32>
    %34 = vector.broadcast %33 : vector<8x1xf32> to vector<8x128xf32>
    %35 = arith.mulf %32, %34 : vector<8x128xf32>
    %36 = arith.addf %31, %35 : vector<8x128xf32>
    %37 = vector.extract_strided_slice %18 {offsets = [0, 121], sizes = [8, 128], strides = [1, 1]} : vector<8x256xf32> to vector<8x128xf32>
    %38 = vector.extract_strided_slice %5 {offsets = [0, 3], sizes = [8, 1], strides = [1, 1]} : vector<8x11xf32> to vector<8x1xf32>
    %39 = vector.broadcast %38 : vector<8x1xf32> to vector<8x128xf32>
    %40 = arith.mulf %37, %39 : vector<8x128xf32>
    %41 = arith.addf %36, %40 : vector<8x128xf32>
    %42 = vector.extract_strided_slice %18 {offsets = [0, 122], sizes = [8, 128], strides = [1, 1]} : vector<8x256xf32> to vector<8x128xf32>
    %43 = vector.extract_strided_slice %5 {offsets = [0, 4], sizes = [8, 1], strides = [1, 1]} : vector<8x11xf32> to vector<8x1xf32>
    %44 = vector.broadcast %43 : vector<8x1xf32> to vector<8x128xf32>
    %45 = arith.mulf %42, %44 : vector<8x128xf32>
    %46 = arith.addf %41, %45 : vector<8x128xf32>
    %47 = vector.extract_strided_slice %18 {offsets = [0, 123], sizes = [8, 128], strides = [1, 1]} : vector<8x256xf32> to vector<8x128xf32>
    %48 = vector.extract_strided_slice %5 {offsets = [0, 5], sizes = [8, 1], strides = [1, 1]} : vector<8x11xf32> to vector<8x1xf32>
    %49 = vector.broadcast %48 : vector<8x1xf32> to vector<8x128xf32>
    %50 = arith.mulf %47, %49 : vector<8x128xf32>
    %51 = arith.addf %46, %50 : vector<8x128xf32>
    %52 = vector.extract_strided_slice %18 {offsets = [0, 124], sizes = [8, 128], strides = [1, 1]} : vector<8x256xf32> to vector<8x128xf32>
    %53 = vector.extract_strided_slice %5 {offsets = [0, 6], sizes = [8, 1], strides = [1, 1]} : vector<8x11xf32> to vector<8x1xf32>
    %54 = vector.broadcast %53 : vector<8x1xf32> to vector<8x128xf32>
    %55 = arith.mulf %52, %54 : vector<8x128xf32>
    %56 = arith.addf %51, %55 : vector<8x128xf32>
    %57 = vector.extract_strided_slice %18 {offsets = [0, 125], sizes = [8, 128], strides = [1, 1]} : vector<8x256xf32> to vector<8x128xf32>
    %58 = vector.extract_strided_slice %5 {offsets = [0, 7], sizes = [8, 1], strides = [1, 1]} : vector<8x11xf32> to vector<8x1xf32>
    %59 = vector.broadcast %58 : vector<8x1xf32> to vector<8x128xf32>
    %60 = arith.mulf %57, %59 : vector<8x128xf32>
    %61 = arith.addf %56, %60 : vector<8x128xf32>
    %62 = vector.extract_strided_slice %18 {offsets = [0, 126], sizes = [8, 128], strides = [1, 1]} : vector<8x256xf32> to vector<8x128xf32>
    %63 = vector.extract_strided_slice %5 {offsets = [0, 8], sizes = [8, 1], strides = [1, 1]} : vector<8x11xf32> to vector<8x1xf32>
    %64 = vector.broadcast %63 : vector<8x1xf32> to vector<8x128xf32>
    %65 = arith.mulf %62, %64 : vector<8x128xf32>
    %66 = arith.addf %61, %65 : vector<8x128xf32>
    %67 = vector.extract_strided_slice %18 {offsets = [0, 127], sizes = [8, 128], strides = [1, 1]} : vector<8x256xf32> to vector<8x128xf32>
    %68 = vector.extract_strided_slice %5 {offsets = [0, 9], sizes = [8, 1], strides = [1, 1]} : vector<8x11xf32> to vector<8x1xf32>
    %69 = vector.broadcast %68 : vector<8x1xf32> to vector<8x128xf32>
    %70 = arith.mulf %67, %69 : vector<8x128xf32>
    %71 = arith.addf %66, %70 : vector<8x128xf32>
    %cst = arith.constant dense<0.000000e+00> : vector<128xf32>
    %72 = vector.multi_reduction <add>, %71, %cst [0] : vector<8x128xf32> to vector<128xf32>
    %73 = vector.shape_cast %72 : vector<128xf32> to vector<1x128xf32>
    %74 = vector.broadcast %73 : vector<1x128xf32> to vector<8x128xf32>
    %75 = arith.subf %12, %74 : vector<8x128xf32>
    %76 = arith.mulf %75, %75 : vector<8x128xf32>
    %c0_i32_15 = arith.constant 0 : i32
    %77 = arith.cmpi eq, %2, %c0_i32_15 : i32
    %78 = arith.andi %0, %77 : i1
    %79 = arith.extui %78 : i1 to i32
    %c0_i32_16 = arith.constant 0 : i32
    %80 = arith.cmpi ne, %79, %c0_i32_16 : i32
    scf.if %80 {
      %154 = vector.extract_strided_slice %76 {offsets = [0, 0], sizes = [8, 1], strides = [1, 1]} : vector<8x128xf32> to vector<8x1xf32>
      %155 = vector.shape_cast %154 : vector<8x1xf32> to vector<8x1xf32>
      %156 = vector.broadcast %155 : vector<8x1xf32> to vector<8x128xf32>
      %c0_28 = arith.constant 0 : index
      %c0_29 = arith.constant 0 : index
      %157 = vector.load %arg9[%c0_28, %c0_29] : memref<8x128xf32, #tpu.memory_space<vmem>>, vector<8x128xf32>
      tpu.vector_store %arg9[%c0_28, %c0_29], %156 {strides = array<i32>} : memref<8x128xf32, #tpu.memory_space<vmem>>, vector<8x128xf32>,
    } else {
    }
    %c0_17 = arith.constant 0 : index
    %c0_18 = arith.constant 0 : index
    %81 = vector.load %arg9[%c0_17, %c0_18] : memref<8x128xf32, #tpu.memory_space<vmem>>, vector<8x128xf32>
    %82 = tpu.concatenate %81, %76 in 1 : vector<8x128xf32>, vector<8x128xf32> -> vector<8x256xf32>
    %83 = vector.extract_strided_slice %6 {offsets = [0, 10], sizes = [8, 1], strides = [1, 1]} : vector<8x11xf32> to vector<8x1xf32>
    %84 = vector.broadcast %83 : vector<8x1xf32> to vector<8x128xf32>
    %85 = arith.mulf %76, %84 : vector<8x128xf32>
    %86 = vector.extract_strided_slice %82 {offsets = [0, 118], sizes = [8, 128], strides = [1, 1]} : vector<8x256xf32> to vector<8x128xf32>
    %87 = vector.extract_strided_slice %6 {offsets = [0, 0], sizes = [8, 1], strides = [1, 1]} : vector<8x11xf32> to vector<8x1xf32>
    %88 = vector.broadcast %87 : vector<8x1xf32> to vector<8x128xf32>
    %89 = arith.mulf %86, %88 : vector<8x128xf32>
    %90 = arith.addf %85, %89 : vector<8x128xf32>
    %91 = vector.extract_strided_slice %82 {offsets = [0, 119], sizes = [8, 128], strides = [1, 1]} : vector<8x256xf32> to vector<8x128xf32>
    %92 = vector.extract_strided_slice %6 {offsets = [0, 1], sizes = [8, 1], strides = [1, 1]} : vector<8x11xf32> to vector<8x1xf32>
    %93 = vector.broadcast %92 : vector<8x1xf32> to vector<8x128xf32>
    %94 = arith.mulf %91, %93 : vector<8x128xf32>
    %95 = arith.addf %90, %94 : vector<8x128xf32>
    %96 = vector.extract_strided_slice %82 {offsets = [0, 120], sizes = [8, 128], strides = [1, 1]} : vector<8x256xf32> to vector<8x128xf32>
    %97 = vector.extract_strided_slice %6 {offsets = [0, 2], sizes = [8, 1], strides = [1, 1]} : vector<8x11xf32> to vector<8x1xf32>
    %98 = vector.broadcast %97 : vector<8x1xf32> to vector<8x128xf32>
    %99 = arith.mulf %96, %98 : vector<8x128xf32>
    %100 = arith.addf %95, %99 : vector<8x128xf32>
    %101 = vector.extract_strided_slice %82 {offsets = [0, 121], sizes = [8, 128], strides = [1, 1]} : vector<8x256xf32> to vector<8x128xf32>
    %102 = vector.extract_strided_slice %6 {offsets = [0, 3], sizes = [8, 1], strides = [1, 1]} : vector<8x11xf32> to vector<8x1xf32>
    %103 = vector.broadcast %102 : vector<8x1xf32> to vector<8x128xf32>
    %104 = arith.mulf %101, %103 : vector<8x128xf32>
    %105 = arith.addf %100, %104 : vector<8x128xf32>
    %106 = vector.extract_strided_slice %82 {offsets = [0, 122], sizes = [8, 128], strides = [1, 1]} : vector<8x256xf32> to vector<8x128xf32>
    %107 = vector.extract_strided_slice %6 {offsets = [0, 4], sizes = [8, 1], strides = [1, 1]} : vector<8x11xf32> to vector<8x1xf32>
    %108 = vector.broadcast %107 : vector<8x1xf32> to vector<8x128xf32>
    %109 = arith.mulf %106, %108 : vector<8x128xf32>
    %110 = arith.addf %105, %109 : vector<8x128xf32>
    %111 = vector.extract_strided_slice %82 {offsets = [0, 123], sizes = [8, 128], strides = [1, 1]} : vector<8x256xf32> to vector<8x128xf32>
    %112 = vector.extract_strided_slice %6 {offsets = [0, 5], sizes = [8, 1], strides = [1, 1]} : vector<8x11xf32> to vector<8x1xf32>
    %113 = vector.broadcast %112 : vector<8x1xf32> to vector<8x128xf32>
    %114 = arith.mulf %111, %113 : vector<8x128xf32>
    %115 = arith.addf %110, %114 : vector<8x128xf32>
    %116 = vector.extract_strided_slice %82 {offsets = [0, 124], sizes = [8, 128], strides = [1, 1]} : vector<8x256xf32> to vector<8x128xf32>
    %117 = vector.extract_strided_slice %6 {offsets = [0, 6], sizes = [8, 1], strides = [1, 1]} : vector<8x11xf32> to vector<8x1xf32>
    %118 = vector.broadcast %117 : vector<8x1xf32> to vector<8x128xf32>
    %119 = arith.mulf %116, %118 : vector<8x128xf32>
    %120 = arith.addf %115, %119 : vector<8x128xf32>
    %121 = vector.extract_strided_slice %82 {offsets = [0, 125], sizes = [8, 128], strides = [1, 1]} : vector<8x256xf32> to vector<8x128xf32>
    %122 = vector.extract_strided_slice %6 {offsets = [0, 7], sizes = [8, 1], strides = [1, 1]} : vector<8x11xf32> to vector<8x1xf32>
    %123 = vector.broadcast %122 : vector<8x1xf32> to vector<8x128xf32>
    %124 = arith.mulf %121, %123 : vector<8x128xf32>
    %125 = arith.addf %120, %124 : vector<8x128xf32>
    %126 = vector.extract_strided_slice %82 {offsets = [0, 126], sizes = [8, 128], strides = [1, 1]} : vector<8x256xf32> to vector<8x128xf32>
    %127 = vector.extract_strided_slice %6 {offsets = [0, 8], sizes = [8, 1], strides = [1, 1]} : vector<8x11xf32> to vector<8x1xf32>
    %128 = vector.broadcast %127 : vector<8x1xf32> to vector<8x128xf32>
    %129 = arith.mulf %126, %128 : vector<8x128xf32>
    %130 = arith.addf %125, %129 : vector<8x128xf32>
    %131 = vector.extract_strided_slice %82 {offsets = [0, 127], sizes = [8, 128], strides = [1, 1]} : vector<8x256xf32> to vector<8x128xf32>
    %132 = vector.extract_strided_slice %6 {offsets = [0, 9], sizes = [8, 1], strides = [1, 1]} : vector<8x11xf32> to vector<8x1xf32>
    %133 = vector.broadcast %132 : vector<8x1xf32> to vector<8x128xf32>
    %134 = arith.mulf %131, %133 : vector<8x128xf32>
    %135 = arith.addf %130, %134 : vector<8x128xf32>
    %cst_19 = arith.constant dense<0.000000e+00> : vector<128xf32>
    %136 = vector.multi_reduction <add>, %135, %cst_19 [0] : vector<8x128xf32> to vector<128xf32>
    %137 = vector.shape_cast %136 : vector<128xf32> to vector<1x128xf32>
    %cst_20 = arith.constant 9.99999974E-6 : f32
    %138 = vector.broadcast %cst_20 : f32 to vector<1x128xf32>
    %139 = arith.addf %137, %138 : vector<1x128xf32>
    %140 = math.rsqrt %139 : vector<1x128xf32>
    %141 = vector.broadcast %140 : vector<1x128xf32> to vector<8x128xf32>
    %142 = arith.mulf %75, %141 : vector<8x128xf32>
    %143 = vector.broadcast %7 : vector<8x1xf32> to vector<8x128xf32>
    %144 = arith.mulf %142, %143 : vector<8x128xf32>
    %145 = vector.broadcast %8 : vector<8x1xf32> to vector<8x128xf32>
    %146 = arith.addf %144, %145 : vector<8x128xf32>
    %147 = tpu.transpose %146, [1, 0] : vector<8x128xf32> -> vector<128x8xf32>
    %c0_21 = arith.constant 0 : index
    %148 = arith.index_cast %4 : i32 to index
    %c0_22 = arith.constant 0 : index
    %149 = vector.load %arg7[%c0_21, %148, %c0_22] : memref<1x128x8xf32, #tpu.memory_space<vmem>>, vector<1x128x8xf32>
    %150 = vector.shape_cast %149 : vector<1x128x8xf32> to vector<128x8xf32>
    %151 = vector.shape_cast %147 : vector<128x8xf32> to vector<1x128x8xf32>
    tpu.vector_store %arg7[%c0_21, %148, %c0_22], %151 {strides = array<i32>} : memref<1x128x8xf32, #tpu.memory_space<vmem>>, vector<1x128x8xf32>,
    %c0_23 = arith.constant 0 : index
    %c0_24 = arith.constant 0 : index
    %152 = vector.load %arg8[%c0_23, %c0_24] : memref<8x128xf32, #tpu.memory_space<vmem>>, vector<8x128xf32>
    tpu.vector_store %arg8[%c0_23, %c0_24], %12 {strides = array<i32>} : memref<8x128xf32, #tpu.memory_space<vmem>>, vector<8x128xf32>,
    %c0_25 = arith.constant 0 : index
    %c0_26 = arith.constant 0 : index
    %153 = vector.load %arg9[%c0_25, %c0_26] : memref<8x128xf32, #tpu.memory_space<vmem>>, vector<8x128xf32>
    tpu.vector_store %arg9[%c0_25, %c0_26], %76 {strides = array<i32>} : memref<8x128xf32, #tpu.memory_space<vmem>>, vector<8x128xf32>,
    %c1_i32_27 = arith.constant 1 : i32
    return
  }
  func.func @transform_0(%arg0: i32, %arg1: i32) -> (i32, i32, i32) {
    %c0_i32 = arith.constant 0 : i32
    %c0_i32_0 = arith.constant 0 : i32
    return %arg0, %arg1, %c0_i32 : i32, i32, i32
  }
  func.func @transform_1(%arg0: i32, %arg1: i32) -> (i32, i32) {
    %c0_i32 = arith.constant 0 : i32
    %c0_i32_0 = arith.constant 0 : i32
    %c0_i32_1 = arith.constant 0 : i32
    return %c0_i32, %c0_i32_0 : i32, i32
  }
  func.func @transform_2(%arg0: i32, %arg1: i32) -> (i32, i32) {
    %c0_i32 = arith.constant 0 : i32
    %c0_i32_0 = arith.constant 0 : i32
    %c0_i32_1 = arith.constant 0 : i32
    return %c0_i32, %c0_i32_0 : i32, i32
  }
  func.func @transform_3(%arg0: i32, %arg1: i32) -> (i32, i32) {
    %c0_i32 = arith.constant 0 : i32
    %c0_i32_0 = arith.constant 0 : i32
    %c0_i32_1 = arith.constant 0 : i32
    return %c0_i32, %c0_i32_0 : i32, i32
  }
  func.func @transform_4(%arg0: i32, %arg1: i32) -> (i32, i32) {
    %c0_i32 = arith.constant 0 : i32
    %c0_i32_0 = arith.constant 0 : i32
    %c0_i32_1 = arith.constant 0 : i32
    return %c0_i32, %c0_i32_0 : i32, i32
  }
  func.func @transform_5(%arg0: i32, %arg1: i32) -> (i32, i32, i32) {
    %c0_i32 = arith.constant 0 : i32
    %c0_i32_0 = arith.constant 0 : i32
    return %arg0, %arg1, %c0_i32 : i32, i32, i32
  }
}

</mosaic_0001>

<bundles_post_ra>
// kernel: tpu_custom_call.1
= control target key start
LH: loop header
LB: loop body
LE: loop exit
PB: predicated region body
PF: predicated region fallthrough
CT: control target
= control target key end

     0   :  { %s1244_s18 = smov 0   ;;  %s1246_s19 = smov 0   ;;  %s1474_s0 = inlined_call_operand.vmem [shape: f32[2,32,8], index: 0, kind: input, shape index: {}]   ;;  %s1475_s1 = inlined_call_operand.vmem [shape: f32[8,11], index: 1, kind: input, shape index: {}]   ;;  %s1476_s2 = inlined_call_operand.vmem [shape: f32[8,11], index: 2, kind: input, shape index: {}]   ;;  %s1477_s3 = inlined_call_operand.vmem [shape: f32[8,1], index: 3, kind: input, shape index: {}]   ;;  %s1478_s4 = inlined_call_operand.vmem [shape: f32[8,1], index: 4, kind: input, shape index: {}]   ;;  %s1479_s5 = inlined_call_operand.vmem [shape: f32[2,32,8], index: 5, kind: output, shape index: {}]  }
   0x1   :  { %s1248_s20 = smov 0   ;;  %s1250_s21 = smov 0  }
   0x2   :  { %s1252_s22 = smov 0  }
   0x3 LB: > { %s990_s23 = sadd.s32 4294967295, %s1187_s22   ;;  %s27_s24 = sadd.s32 1, %s1183_s21  ;;  %s1187_s22 = sphi %s1252_s22, %s15_s22   ;;  %s1183_s21 = sphi %s1250_s21, %s1484_s21   ;;  %s1179_s20 = sphi %s1248_s20, %s1483_s20   ;;  %s1175_s19 = sphi %s1246_s19, %s1482_s19   ;;  %s1171_s18 = sphi %s1244_s18, %s1481_s18  }
   0x4   : > { %p29_p0 = scmp.ge.s32.totalorder %s27_s24, 2  ;;  %s148_s25 = sadd.s32 1, %s1175_s19 }
   0x5   : > { %p158_p1 = scmp.ne.s32.totalorder %s1175_s19, %s1171_s18  ;;  %p159_p2 = scmp.eq.s32.totalorder %s990_s23, 1 }
   0x6   : > { %s1486_s24 = smov (%p29_p0, %s27_s24), 0  ;;  %p994_p4 = scmp.ge.s32.totalorder %s1187_s22, 1 }
   0x7   : > { %p1276_p3 = por %p159_p2, %p158_p1  ;;  %s143_s27 = ssub.s32 %s1183_s21, %s1486_s24 }
   0x8   : > { %p212_p5 = scmp.lt.s32.totalorder %s1187_s22, 3  ;;  %p146_p6 = scmp.eq.s32.totalorder %s143_s27, 0 }
   0xa   : > { %p213_p7 = pnand %p994_p4, %p212_p5 }
   0xb   : > { %s1285_s28 = scalar_select %p146_p6, %s1175_s19, %s148_s25  }
   0xc   : > { %216 = sbr.rel (%p213_p7) target bundleno = 1115 (0x45b), region = 40  ;;  %p248_p8 = scmp.lt.s32.totalorder (!%p213_p7), %s1179_s20, 1 }
   0xd   : > { %s1204_s11 = smov (!%p213_p7), 10   ;;  %s1205_s12 = smov (!%p213_p7), 9  }
   0xe   : > { %s1206_s13 = smov (!%p213_p7), 8   ;;  %s1207_s14 = smov (!%p213_p7), 7  }
   0xf   : > { %s1208_s15 = smov (!%p213_p7), 6   ;;  %s1209_s16 = smov (!%p213_p7), 5  }
  0x10   : > { %s1210_s17 = smov (!%p213_p7), 4   ;;  %s1211_s23 = smov (!%p213_p7), 3  }
  0x11   : > { %v263_v0 = vld [vmem:[%s1475_s1] sm:$0xff]  ;;  %v1193_v1 = vmov 0   ;;  %v1194_v2 = vmov 1   ;;  %s249_s6 = scalar_select %p248_p8, %s1179_s20, 1  ;;  %v1195_v4 = vmov 3   ;;  %v1196_v5 = vmov 2  }
  0x12   : > { %1107 = vset.pattern.permute.xlu1 %v1193_v1  ;;  %1108 = vset.pattern.permute.xlu2 %v1194_v2  ;;  %v1197_v7 = vmov 5   ;;  %v1198_v8 = vmov 4   ;;  %v1199_v11 = vmov 7   ;;  %v1200_v12 = vmov 6   ;;  %s1212_s25 = smov 2   ;;  %s1213_s27 = smov 1  }
  0x13   : > { %332 = vperm.xlu1 %1107, %v263_v0   ;;  %348 = vperm.xlu2 %1108, %v263_v0   ;;  %s1011_s7 = sshll.u32 %s249_s6, 5  ;;  %v1201_v14 = vmov 9   ;;  %v1202_v15 = vmov 8   ;;  %v1203_v17 = vmov 10   ;;  %v264_v56 = vld [vmem:[%s1476_s2] sm:$0xff]  ;;  %vm343_vm0 = vcmask 80896  }
  0x14   : > { %s1296_s10 = scalar_lea.vmem %s1474_s0, %s1011_s7  ;;  %vm359_vm1 = vcmask 72704   ;;  %vm375_vm2 = vcmask 64512   ;;  %vm391_vm3 = vcmask 56320   ;;  %vm407_vm4 = vcmask 48128  }
  0x15   : > { %v267_v3 = vld [vmem:[%s1296_s10] sm:$0xff]  ;;  %v268_v6 = vld [vmem:[%s1296_s10 + $0x8] sm:$0xff]  ;;  %v269_v9 = vld [vmem:[%s1296_s10 + $0x10] sm:$0xff]  ;;  %vm423_vm5 = vcmask 39936   ;;  %vm439_vm6 = vcmask 31744   ;;  %vm455_vm7 = vcmask 23552  }
  0x16   : > { %283 = vxpose.xlu0.b32.start [1/16] (narrow) %v267_v3, 8  ;;  %v270_v10 = vld [vmem:[%s1296_s10 + $0x18] sm:$0xff]  ;;  %v271_v13 = vld [vmem:[%s1296_s10 + $0x20] sm:$0xff]  ;;  %v272_v16 = vld [vmem:[%s1296_s10 + $0x28] sm:$0xff]  ;;  %vm471_vm8 = vcmask 15360   ;;  %vm487_vm9 = vcmask 7168  }
  0x17   : > { %v273_v18 = vld [vmem:[%s1296_s10 + $0x30] sm:$0xff]  ;;  %v274_v19 = vld [vmem:[%s1296_s10 + $0x38] sm:$0xff]  ;;  %v275_v20 = vld [vmem:[%s1296_s10 + $0x40] sm:$0xff] }
  0x18   : > { %v276_v21 = vld [vmem:[%s1296_s10 + $0x48] sm:$0xff]  ;;  %v277_v22 = vld [vmem:[%s1296_s10 + $0x50] sm:$0xff]  ;;  %v278_v23 = vld [vmem:[%s1296_s10 + $0x58] sm:$0xff] }
  0x19   : > { %v279_v24 = vld [vmem:[%s1296_s10 + $0x60] sm:$0xff]  ;;  %v280_v25 = vld [vmem:[%s1296_s10 + $0x68] sm:$0xff]  ;;  %v281_v26 = vld [vmem:[%s1296_s10 + $0x70] sm:$0xff] }
  0x1a   : > { %v282_v27 = vld [vmem:[%s1296_s10 + $0x78] sm:$0xff]  ;;  %s242_s10 = sand.u32 1, %s1171_s18   ;;  %s1012_s18 = sshll.u32 (%p1276_p3), %s1179_s20, 5 }
  0x1b   : > { %1110 = vset.pattern.permute.xlu1 %v1195_v4  ;;  %1109 = vset.pattern.permute.xlu2 %v1196_v5 }
  0x1c   : > { %380 = vperm.xlu1 %1110, %v263_v0   ;;  %364 = vperm.xlu2 %1109, %v263_v0  }
  0x1e   : > { %284 = vxpose.xlu0.b32.cont [2/16] (narrow) %v268_v6, 8 }
  0x24   : > { %1112 = vset.pattern.permute.xlu1 %v1197_v7  ;;  %1111 = vset.pattern.permute.xlu2 %v1198_v8 }
  0x25   : > { %412 = vperm.xlu1 %1112, %v263_v0   ;;  %396 = vperm.xlu2 %1111, %v263_v0  }
  0x26   : > { %285 = vxpose.xlu0.b32.cont [3/16] (narrow) %v269_v9, 8 }
  0x2d   : > { %1114 = vset.pattern.permute.xlu1 %v1199_v11  ;;  %1113 = vset.pattern.permute.xlu2 %v1200_v12 }
  0x2e   : > { %444 = vperm.xlu1 %1114, %v263_v0   ;;  %428 = vperm.xlu2 %1113, %v263_v0  }
  0x2f   : > { %286 = vxpose.xlu0.b32.cont [4/16] (narrow) %v270_v10, 8 }
  0x36   : > { %1116 = vset.pattern.permute.xlu1 %v1201_v14  ;;  %1115 = vset.pattern.permute.xlu2 %v1202_v15 }
  0x37   : > { %476 = vperm.xlu1 %1116, %v263_v0   ;;  %460 = vperm.xlu2 %1115, %v263_v0  }
  0x38   : > { %287 = vxpose.xlu0.b32.cont [5/16] (narrow) %v271_v13, 8 }
  0x3f   : > { %1118 = vset.pattern.permute.xlu1 %v1193_v1  ;;  %1117 = vset.pattern.permute.xlu2 %v1203_v17 }
  0x40   : > { %288 = vxpose.xlu0.b32.cont [6/16] (narrow) %v272_v16, 8  ;;  %327 = vperm.xlu2 %1117, %v263_v0  }
  0x48   : > { %289 = vxpose.xlu0.b32.cont [7/16] (narrow) %v273_v18, 8  ;;  %1120 = vset.pattern.permute.xlu2 %v1194_v2 }
  0x50   : > { %290 = vxpose.xlu0.b32.cont [8/16] (narrow) %v274_v19, 8 }
  0x58   : > { %291 = vxpose.xlu0.b32.cont [9/16] (narrow) %v275_v20, 8 }
  0x60   : > { %292 = vxpose.xlu0.b32.cont [10/16] (narrow) %v276_v21, 8 }
  0x68   : > { %293 = vxpose.xlu0.b32.cont [11/16] (narrow) %v277_v22, 8 }
  0x6d   : > { %v349_v31 = vpop.permute.xlu2 %348 }
  0x70   : > { %294 = vxpose.xlu0.b32.cont [12/16] (narrow) %v278_v23, 8 }
  0x76   : > { %v365_v33 = vpop.permute.xlu2 %364 }
  0x78   : > { %295 = vxpose.xlu0.b32.cont [13/16] (narrow) %v279_v24, 8 }
  0x7f   : > { %v397_v37 = vpop.permute.xlu2 %396 }
  0x80   : > { %296 = vxpose.xlu0.b32.cont [14/16] (narrow) %v280_v25, 8 }
  0x85   : > { %v333_v28 = vpop.permute.xlu1 %332 }
  0x88   : > { %297 = vxpose.xlu0.b32.cont [15/16] (narrow) %v281_v26, 8  ;;  %v429_v41 = vpop.permute.xlu2 %428 }
  0x8e   : > { %v381_v35 = vpop.permute.xlu1 %380 }
  0x90   : > { %298 = vxpose.xlu0.b32.end [16/16] (narrow) %v282_v27, 8 }
  0x91   : > { %v461_v45 = vpop.permute.xlu2 %460 }
  0x97   : > { %v413_v39 = vpop.permute.xlu1 %412 }
  0x9a   : > { %v328_v61 = vpop.permute.xlu2 %327 }
  0xa0   : > { %v445_v43 = vpop.permute.xlu1 %444 }
  0xa9   : > { %v477_v47 = vpop.permute.xlu1 %476 }
  0xbc   : > { %v1324_v29 = vpop.trf.xlu0 }
  0xbd   : > { %320 = vperm.xlu1 %1118, %v1324_v29   ;;  %v336_v30 = vmul.f32 %v333_v28, %v1324_v29  ;;  %v352_v32 = vmul.f32 %v349_v31, %v1324_v29  ;;  %v368_v34 = vmul.f32 %v365_v33, %v1324_v29  ;;  %v384_v36 = vmul.f32 %v381_v35, %v1324_v29 }
  0xbe   : > { %v400_v38 = vmul.f32 %v397_v37, %v1324_v29  ;;  %v416_v40 = vmul.f32 %v413_v39, %v1324_v29  ;;  %v432_v42 = vmul.f32 %v429_v41, %v1324_v29  ;;  %v448_v44 = vmul.f32 %v445_v43, %v1324_v29 }
  0xbf   : > { %341 = vrot.lane.b32.xlu2 %v336_v30, %s1204_s11  ;;  %v464_v46 = vmul.f32 %v461_v45, %v1324_v29  ;;  %v480_v48 = vmul.f32 %v477_v47, %v1324_v29 }
  0xc7   : > { %357 = vrot.lane.b32.xlu2 %v352_v32, %s1205_s12 }
  0xcf   : > { %373 = vrot.lane.b32.xlu2 %v368_v34, %s1206_s13 }
  0xd7   : > { %389 = vrot.lane.b32.xlu2 %v384_v36, %s1207_s14 }
  0xdf   : > { %405 = vrot.lane.b32.xlu2 %v400_v38, %s1208_s15 }
  0xe7   : > { %421 = vrot.lane.b32.xlu2 %v416_v40, %s1209_s16 }
  0xef   : > { %437 = vrot.lane.b32.xlu2 %v432_v42, %s1210_s17 }
  0xf7   : > { %453 = vrot.lane.b32.xlu2 %v448_v44, %s1211_s23  ;;  %1119 = vset.pattern.permute.xlu0 %v1193_v1 }
  0xff   : > { %469 = vrot.lane.b32.xlu2 %v464_v46, %s1212_s25 }
 0x107   : > { %485 = vrot.lane.b32.xlu2 %v480_v48, %s1213_s27 }
 0x10f   : > { %531 = vperm.xlu2 %1120, %v264_v56  }
 0x117   : > { %1122 = vset.pattern.permute.xlu2 %v1195_v4 }
 0x118   : > { %561 = vperm.xlu2 %1122, %v264_v56  }
 0x119   : > { %v342_v62 = vpop.permute.xlu2 %341 }
 0x120   : > { %1124 = vset.pattern.permute.xlu2 %v1197_v7 }
 0x121   : > { %591 = vperm.xlu2 %1124, %v264_v56   ;;  %v358_v63 = vpop.permute.xlu2 %357 }
 0x129   : > { %1126 = vset.pattern.permute.xlu2 %v1199_v11  ;;  %v374_v2 = vpop.permute.xlu2 %373 }
 0x12a   : > { %621 = vperm.xlu2 %1126, %v264_v56  }
 0x12f   : > { %v321_v49 = vpop.permute.xlu1 %320 }
 0x130   : > { %v335_v50 = vmul.f32 %v333_v28, %v321_v49  ;;  %v351_v51 = vmul.f32 %v349_v31, %v321_v49  ;;  %v367_v52 = vmul.f32 %v365_v33, %v321_v49  ;;  %v383_v53 = vmul.f32 %v381_v35, %v321_v49 }
 0x131   : > { %v399_v54 = vmul.f32 %v397_v37, %v321_v49  ;;  %v415_v55 = vmul.f32 %v413_v39, %v321_v49  ;;  %v431_v57 = vmul.f32 %v429_v41, %v321_v49  ;;  %v447_v58 = vmul.f32 %v445_v43, %v321_v49  ;;  %v390_v4 = vpop.permute.xlu2 %389 }
 0x132   : > { %339 = vrot.lane.b32.xlu1 %v335_v50, %s1204_s11  ;;  %v463_v59 = vmul.f32 %v461_v45, %v321_v49  ;;  %v479_v60 = vmul.f32 %v477_v47, %v321_v49  ;;  %1128 = vset.pattern.permute.xlu2 %v1201_v14 }
 0x133   : > { %651 = vperm.xlu2 %1128, %v264_v56  }
 0x139   : > { %v406_v6 = vpop.permute.xlu2 %405 }
 0x13a   : > { %355 = vrot.lane.b32.xlu1 %v351_v51, %s1205_s12 }
 0x142   : > { %371 = vrot.lane.b32.xlu1 %v367_v52, %s1206_s13 }
 0x14a   : > { %387 = vrot.lane.b32.xlu1 %v383_v53, %s1207_s14 }
 0x152   : > { %403 = vrot.lane.b32.xlu1 %v399_v54, %s1208_s15 }
 0x15a   : > { %419 = vrot.lane.b32.xlu1 %v415_v55, %s1209_s16 }
 0x162   : > { %435 = vrot.lane.b32.xlu1 %v431_v57, %s1210_s17 }
 0x16a   : > { %451 = vrot.lane.b32.xlu1 %v447_v58, %s1211_s23 }
 0x172   : > { %467 = vrot.lane.b32.xlu1 %v463_v59, %s1212_s25 }
 0x17a   : > { %483 = vrot.lane.b32.xlu1 %v479_v60, %s1213_s27  ;;  %v265_v60 = vld [vmem:[%s1477_s3] sm:$0xff] }
 0x182   : > { %516 = vperm.xlu1 %1118, %v264_v56  }
 0x18a   : > { %1121 = vset.pattern.permute.xlu1 %v1196_v5 }
 0x18b   : > { %546 = vperm.xlu1 %1121, %v264_v56  }
 0x193   : > { %1123 = vset.pattern.permute.xlu1 %v1198_v8  ;;  %v422_v8 = vpop.permute.xlu2 %421 }
 0x194   : > { %576 = vperm.xlu1 %1123, %v264_v56  }
 0x19b   : > { %v438_v11 = vpop.permute.xlu2 %437 }
 0x19c   : > { %1125 = vset.pattern.permute.xlu1 %v1200_v12 }
 0x19d   : > { %606 = vperm.xlu1 %1125, %v264_v56  }
 0x1a3   : > { %v454_v13 = vpop.permute.xlu2 %453 }
 0x1a4   : > { %v340_v0 = vpop.permute.xlu1 %339 }
 0x1a5   : > { %1127 = vset.pattern.permute.xlu1 %v1202_v15  ;;  %v344_v14 = vsel %vm343_vm0, %v340_v0, %v342_v62  ;;  %v330_v15 = vmul.f32 %v328_v61, %v1324_v29 }
 0x1a6   : > { %636 = vperm.xlu1 %1127, %v264_v56  }
 0x1ab   : > { %v470_v23 = vpop.permute.xlu2 %469 }
 0x1ac   : > { %v356_v3 = vpop.permute.xlu1 %355 }
 0x1ad   : > { %v360_v16 = vsel %vm359_vm1, %v356_v3, %v358_v63 }
 0x1ae   : > { %1129 = vset.pattern.permute.xlu1 %v1203_v17  ;;  %v346_v17 = vadd.f32 %v344_v14, %v330_v15 }
 0x1af   : > { %511 = vperm.xlu1 %1129, %v264_v56  }
 0x1b0   : > { %v362_v19 = vadd.f32 %v360_v16, %v346_v17 }
 0x1b3   : > { %v486_v35 = vpop.permute.xlu2 %485 }
 0x1b4   : > { %v372_v5 = vpop.permute.xlu1 %371 }
 0x1b5   : > { %v376_v18 = vsel %vm375_vm2, %v372_v5, %v374_v2 }
 0x1b6   : > { %v378_v21 = vadd.f32 %v376_v18, %v362_v19 }
 0x1b7   : > { %1130 = vset.pattern.permute.xlu1 %v1193_v1 }
 0x1bb   : > { %v532_v52 = vpop.permute.xlu2 %531 }
 0x1bc   : > { %v388_v7 = vpop.permute.xlu1 %387 }
 0x1bd   : > { %v392_v20 = vsel %vm391_vm3, %v388_v7, %v390_v4 }
 0x1be   : > { %v394_v24 = vadd.f32 %v392_v20, %v378_v21 }
 0x1c3   : > { %v562_v55 = vpop.permute.xlu2 %561 }
 0x1c4   : > { %v404_v9 = vpop.permute.xlu1 %403 }
 0x1c5   : > { %v408_v22 = vsel %vm407_vm4, %v404_v9, %v406_v6 }
 0x1c6   : > { %v410_v26 = vadd.f32 %v408_v22, %v394_v24 }
 0x1cb   : > { %v592_v61 = vpop.permute.xlu2 %591 }
 0x1cc   : > { %v420_v10 = vpop.permute.xlu1 %419 }
 0x1cd   : > { %v424_v25 = vsel %vm423_vm5, %v420_v10, %v422_v8 }
 0x1ce   : > { %v426_v30 = vadd.f32 %v424_v25, %v410_v26 }
 0x1d3   : > { %v622_v0 = vpop.permute.xlu2 %621 }
 0x1d4   : > { %v436_v12 = vpop.permute.xlu1 %435 }
 0x1d5   : > { %v440_v28 = vsel %vm439_vm6, %v436_v12, %v438_v11  ;;  %v266_v12 = vld [vmem:[%s1478_s4] sm:$0xff] }
 0x1d6   : > { %v442_v32 = vadd.f32 %v440_v28, %v426_v30 }
 0x1db   : > { %v652_v3 = vpop.permute.xlu2 %651 }
 0x1dc   : > { %v452_v1 = vpop.permute.xlu1 %451 }
 0x1dd   : > { %v456_v31 = vsel %vm455_vm7, %v452_v1, %v454_v13 }
 0x1de   : > { %v458_v34 = vadd.f32 %v456_v31, %v442_v32 }
 0x1e4   : > { %v468_v27 = vpop.permute.xlu1 %467 }
 0x1e5   : > { %v472_v33 = vsel %vm471_vm8, %v468_v27, %v470_v23 }
 0x1e6   : > { %v474_v36 = vadd.f32 %v472_v33, %v458_v34 }
 0x1ec   : > { %v484_v37 = vpop.permute.xlu1 %483 }
 0x1ed   : > { %v488_v38 = vsel %vm487_vm9, %v484_v37, %v486_v35 }
 0x1ee   : > { %v490_v39 = vadd.f32 %v488_v38, %v474_v36 }
 0x1f0   : > { %v491_v40 = vrot.slane %v490_v39, 4 }
 0x1f2   : > { %v492_v41 = vadd.f32 %v491_v40, %v490_v39 }
 0x1f4   : > { %v493_v42 = vrot.slane %v492_v41, 2  ;;  %v517_v43 = vpop.permute.xlu1 %516 }
 0x1f6   : > { %v494_v44 = vadd.f32 %v493_v42, %v492_v41 }
 0x1f8   : > { %v495_v45 = vrot.slane %v494_v44, 1 }
 0x1fa   : > { %v496_v46 = vadd.f32 %v495_v45, %v494_v44 }
 0x1fc   : > { %v1383_v47 = vsub.f32 %v1324_v29, %v496_v46 }
 0x1fd   : > { %v547_v48 = vpop.permute.xlu1 %546 }
 0x1fe   : > { %v1387_v49 = vmul.f32 %v1383_v47, %v1383_v47 }
 0x200   : > { %v520_v50 = vmul.f32 %v517_v43, %v1387_v49  ;;  %504 = vperm.xlu0 %1119, %v1387_v49   ;;  %v535_v53 = vmul.f32 %v532_v52, %v1387_v49  ;;  %v550_v29 = vmul.f32 %v547_v48, %v1387_v49  ;;  %v565_v57 = vmul.f32 %v562_v55, %v1387_v49 }
 0x201   : > { %v595_v62 = vmul.f32 %v592_v61, %v1387_v49  ;;  %v625_v2 = vmul.f32 %v622_v0, %v1387_v49  ;;  %v655_v16 = vmul.f32 %v652_v3, %v1387_v49 }
 0x202   : > { %525 = vrot.lane.b32.xlu1 %v520_v50, %s1204_s11 }
 0x206   : > { %v577_v51 = vpop.permute.xlu1 %576 }
 0x207   : > { %v580_v59 = vmul.f32 %v577_v51, %v1387_v49 }
 0x20a   : > { %540 = vrot.lane.b32.xlu1 %v535_v53, %s1205_s12 }
 0x20f   : > { %v607_v54 = vpop.permute.xlu1 %606 }
 0x210   : > { %v610_v63 = vmul.f32 %v607_v54, %v1387_v49 }
 0x212   : > { %555 = vrot.lane.b32.xlu1 %v550_v29, %s1206_s13 }
 0x218   : > { %v637_v56 = vpop.permute.xlu1 %636 }
 0x219   : > { %v640_v58 = vmul.f32 %v637_v56, %v1387_v49 }
 0x21a   : > { %570 = vrot.lane.b32.xlu1 %v565_v57, %s1207_s14 }
 0x21b   : > { %645 = vrot.lane.b32.xlu0 %v640_v58, %s1212_s25 }
 0x221   : > { %v512_v17 = vpop.permute.xlu1 %511 }
 0x222   : > { %585 = vrot.lane.b32.xlu1 %v580_v59, %s1208_s15  ;;  %v514_v32 = vmul.f32 %v512_v17, %v1387_v49 }
 0x223   : > { %685 = vperm.xlu0 %1119, %v265_v60  }
 0x22a   : > { %600 = vrot.lane.b32.xlu1 %v595_v62, %s1209_s16 }
 0x232   : > { %615 = vrot.lane.b32.xlu1 %v610_v63, %s1210_s17 }
 0x23a   : > { %630 = vrot.lane.b32.xlu1 %v625_v2, %s1211_s23 }
 0x272   : > { %v505_v4 = vpop.permute.xlu0 %504 }
 0x273   : > { %v519_v5 = vmul.f32 %v517_v43, %v505_v4  ;;  %v654_v6 = vmul.f32 %v652_v3, %v505_v4  ;;  %v534_v7 = vmul.f32 %v532_v52, %v505_v4  ;;  %v549_v8 = vmul.f32 %v547_v48, %v505_v4 }
 0x274   : > { %v564_v9 = vmul.f32 %v562_v55, %v505_v4  ;;  %v579_v10 = vmul.f32 %v577_v51, %v505_v4  ;;  %v594_v11 = vmul.f32 %v592_v61, %v505_v4  ;;  %v609_v13 = vmul.f32 %v607_v54, %v505_v4  ;;  %v526_v1 = vpop.permute.xlu1 %525 }
 0x275   : > { %523 = vrot.lane.b32.xlu2 %v519_v5, %s1204_s11  ;;  %658 = vrot.lane.b32.xlu1 %v654_v6, %s1213_s27  ;;  %v624_v14 = vmul.f32 %v622_v0, %v505_v4  ;;  %v639_v15 = vmul.f32 %v637_v56, %v505_v4  ;;  %s995_s11 = sshll.u32 %s242_s10, 7 }
 0x27c   : > { %v541_v19 = vpop.permute.xlu1 %540 }
 0x27d   : > { %538 = vrot.lane.b32.xlu2 %v534_v7, %s1205_s12  ;;  %691 = vperm.xlu1 %1130, %v266_v12   ;;  %s1439_s12 = scalar_lea.vmem [#allocation4], %s995_s11  }
 0x284   : > { %v556_v21 = vpop.permute.xlu1 %555 }
 0x285   : > { %553 = vrot.lane.b32.xlu2 %v549_v8, %s1206_s13 }
 0x28c   : > { %v571_v23 = vpop.permute.xlu1 %570 }
 0x28d   : > { %568 = vrot.lane.b32.xlu2 %v564_v9, %s1207_s14  ;;  %v646_v51 = vpop.permute.xlu0 %645 }
 0x294   : > { %v586_v26 = vpop.permute.xlu1 %585 }
 0x295   : > { %583 = vrot.lane.b32.xlu2 %v579_v10, %s1208_s15  ;;  %s759_s15 = scalar_lea.vmem (%p1276_p3), %s1479_s5, %s1012_s18  }
 0x29c   : > { %v601_v28 = vpop.permute.xlu1 %600 }
 0x29d   : > { %598 = vrot.lane.b32.xlu2 %v594_v11, %s1209_s16  ;;  %v686_v11 = vpop.permute.xlu0 %685  ;;  %s1189_s16 = smov (%p1276_p3), 0  }
 0x2a4   : > { %v616_v33 = vpop.permute.xlu1 %615 }
 0x2a5   : > { %613 = vrot.lane.b32.xlu2 %v609_v13, %s1210_s17 }
 0x2ac   : > { %v631_v44 = vpop.permute.xlu1 %630 }
 0x2ad   : > { %628 = vrot.lane.b32.xlu2 %v624_v14, %s1211_s23 }
 0x2b5   : > { %643 = vrot.lane.b32.xlu2 %v639_v15, %s1212_s25 }
 0x2bd   : > { %660 = vrot.lane.b32.xlu2 %v655_v16, %s1213_s27 }
 0x2cf   : > { %v524_v18 = vpop.permute.xlu2 %523 }
 0x2d0   : > { %v527_v31 = vsel %vm343_vm0, %v524_v18, %v526_v1 }
 0x2d1   : > { %v529_v35 = vadd.f32 %v527_v31, %v514_v32 }
 0x2d7   : > { %v539_v20 = vpop.permute.xlu2 %538 }
 0x2d8   : > { %v542_v34 = vsel %vm359_vm1, %v539_v20, %v541_v19 }
 0x2d9   : > { %v544_v38 = vadd.f32 %v542_v34, %v529_v35 }
 0x2df   : > { %v554_v22 = vpop.permute.xlu2 %553 }
 0x2e0   : > { %v557_v37 = vsel %vm375_vm2, %v554_v22, %v556_v21 }
 0x2e1   : > { %v559_v40 = vadd.f32 %v557_v37, %v544_v38 }
 0x2e7   : > { %v569_v24 = vpop.permute.xlu2 %568  ;;  %v659_v29 = vpop.permute.xlu1 %658 }
 0x2e8   : > { %v572_v39 = vsel %vm391_vm3, %v569_v24, %v571_v23 }
 0x2e9   : > { %v574_v42 = vadd.f32 %v572_v39, %v559_v40 }
 0x2ef   : > { %v584_v25 = vpop.permute.xlu2 %583  ;;  %v692_v12 = vpop.permute.xlu1 %691 }
 0x2f0   : > { %v587_v41 = vsel %vm407_vm4, %v584_v25, %v586_v26 }
 0x2f1   : > { %v589_v45 = vadd.f32 %v587_v41, %v574_v42 }
 0x2f7   : > { %v599_v27 = vpop.permute.xlu2 %598 }
 0x2f8   : > { %v602_v43 = vsel %vm423_vm5, %v599_v27, %v601_v28 }
 0x2f9   : > { %v604_v49 = vadd.f32 %v602_v43, %v589_v45 }
 0x2ff   : > { %v614_v30 = vpop.permute.xlu2 %613 }
 0x300   : > { %v617_v48 = vsel %vm439_vm6, %v614_v30, %v616_v33 }
 0x301   : > { %v619_v52 = vadd.f32 %v617_v48, %v604_v49 }
 0x307   : > { %v629_v36 = vpop.permute.xlu2 %628 }
 0x308   : > { %v632_v50 = vsel %vm455_vm7, %v629_v36, %v631_v44 }
 0x309   : > { %v634_v54 = vadd.f32 %v632_v50, %v619_v52 }
 0x30f   : > { %v644_v46 = vpop.permute.xlu2 %643 }
 0x310   : > { %v647_v53 = vsel %vm471_vm8, %v644_v46, %v646_v51 }
 0x311   : > { %v649_v55 = vadd.f32 %v647_v53, %v634_v54 }
 0x317   : > { %v661_v56 = vpop.permute.xlu2 %660 }
 0x318   : > { %v662_v57 = vsel %vm487_vm9, %v659_v29, %v661_v56 }
 0x319   : > { %v664_v58 = vadd.f32 %v662_v57, %v649_v55 }
 0x31b   : > { %v665_v59 = vrot.slane %v664_v58, 4 }
 0x31d   : > { %v666_v60 = vadd.f32 %v665_v59, %v664_v58 }
 0x31f   : > { %v667_v61 = vrot.slane %v666_v60, 2 }
 0x321   : > { %v668_v62 = vadd.f32 %v667_v61, %v666_v60 }
 0x323   : > { %v669_v63 = vrot.slane %v668_v62, 1 }
 0x325   : > { %v670_v0 = vadd.f32 %v669_v63, %v668_v62 }
 0x327   : > { %v671_v2 = vadd.f32 1e-05, %v670_v0 }
 0x329   : > { %1131 = vrsqrt.f32 %v671_v2  ;;  %vm678_vm11 = vweird.f32 %v671_v2 }
 0x32f   : > { %v1132_v3 = vpop.eup %1131 }
 0x330   : > { %v673_v4 = vmul.f32 %v1132_v3, %v671_v2  ;;  %vm679_vm10 = vweird.f32 %v1132_v3 }
 0x331   : > { %vm680_vm12 = vmor %vm678_vm11, %vm679_vm10 }
 0x332   : > { %v674_v5 = vmul.f32 %v1132_v3, %v673_v4 }
 0x334   : > { %v675_v6 = vmul.f32 0.5, %v674_v5 }
 0x336   : > { %v676_v7 = vsub.f32 1.5, %v675_v6 }
 0x338   : > { %v677_v8 = vmul.f32 %v1132_v3, %v676_v7 }
 0x33a   : > { %v681_v9 = vsel %vm680_vm12, %v1132_v3, %v677_v8 }
 0x33b   : > { %v682_v10 = vmul.f32 %v681_v9, %v1383_v47 }
 0x33d   : > { %v688_v13 = vmul.f32 %v686_v11, %v682_v10 }
 0x33f   : > { %v694_v14 = vadd.f32 %v692_v12, %v688_v13 }
 0x341   : > { %695 = vxpose.xlu2.b32.start.end [1/1] (short) %v694_v14, 128 }
 0x3da   : > { %v711_v15 = vpop.trf.xlu2 }
 0x3db   : > { %727 = vst.msk [vmem:[%s1439_s12] sm:$0xff] %vm375_vm2, %v711_v15 }
 0x3e2   : > { %v712_v16 = vpop.trf.xlu2 }
 0x3e3   : > { %728 = vst.msk [vmem:[%s1439_s12 + $0x8] sm:$0xff] %vm375_vm2, %v712_v16 }
 0x3ea   : > { %v713_v47 = vpop.trf.xlu2 }
 0x3eb   : > { %729 = vst.msk [vmem:[%s1439_s12 + $0x10] sm:$0xff] %vm375_vm2, %v713_v47 }
 0x3f2   : > { %v714_v17 = vpop.trf.xlu2 }
 0x3f3   : > { %730 = vst.msk [vmem:[%s1439_s12 + $0x18] sm:$0xff] %vm375_vm2, %v714_v17 }
 0x3fa   : > { %v715_v1 = vpop.trf.xlu2 }
 0x402   : > { %v716_v18 = vpop.trf.xlu2 }
 0x40a   : > { %v717_v19 = vpop.trf.xlu2 }
 0x412   : > { %v718_v20 = vpop.trf.xlu2 }
 0x41a   : > { %v719_v21 = vpop.trf.xlu2 }
 0x422   : > { %v720_v22 = vpop.trf.xlu2 }
 0x42a   : > { %v721_v23 = vpop.trf.xlu2 }
 0x432   : > { %v722_v24 = vpop.trf.xlu2 }
 0x43a   : > { %v723_v25 = vpop.trf.xlu2 }
 0x442   : > { %v724_v26 = vpop.trf.xlu2 }
 0x44a   : > { %v725_v27 = vpop.trf.xlu2 }
 0x44e   : > { %751 = sbr.rel (!%p1276_p3) target bundleno = 1115 (0x45b), region = 52 }
 0x452   : > { %v726_v28 = vpop.trf.xlu2 }
 0x453 LB: >> { %v831_v30 = vld [vmem:[%s1439_s12] sm:$0xff]  ;;  %v833_v31 = vld [vmem:[%s1439_s12 + $0x8] sm:$0xff]  ;;  %v835_v32 = vld [vmem:[%s1439_s12 + $0x10] sm:$0xff]  ;;  %s825_s16 = sadd.s32 1, %s1191_s16   ;;  %s1191_s16 = sphi %s1189_s16, %s825_s16  }
 0x454   : >> { %832 = vst [vmem:[%s759_s15] sm:$0xff] %v831_v30  ;;  %v837_v33 = vld [vmem:[%s1439_s12 + $0x18] sm:$0xff]  ;;  %p824_p9 = scmp.ge.s32.totalorder %s825_s16, 1 }
 0x455   : >> { %834 = vst [vmem:[%s759_s15 + $0x8] sm:$0xff] %v833_v31 }
 0x456   : >> { %836 = vst [vmem:[%s759_s15 + $0x10] sm:$0xff] %v835_v32  ;;  %827 = sbr.rel (!%p824_p9) target bundleno = 1107 (0x453), region = 138 }
 0x457   : >> { %838 = vst [vmem:[%s759_s15 + $0x18] sm:$0xff] %v837_v33 }
 0x45b PF: > { %s15_s22 = sadd.s32 1, %s1187_s22   ;;  %s1481_s18 = smov %s1175_s19 }
 0x45c   : > { %p12_p10 = scmp.ge.s32.totalorder %s15_s22, 4   ;;  %s1482_s19 = smov %s1285_s28 }
 0x45d   : > { %s1483_s20 = smov %s1183_s21  ;;  %s1484_s21 = smov %s1486_s24 }
 0x45e   :  { %14 = sbr.rel (!%p12_p10) target bundleno = 3 (0x3), region = 160 }

</bundles_post_ra>
